<compile_context>
chip_gen: v7x
topology: tpu7x:2x2x1
jax: 0.10.0
libtpu: 0.0.40
codegen_flags: <defaults>
</compile_context>

<pallas_src>
import numpy as np
import jax
import jax.numpy as jnp
from jax.experimental import pallas as pl
from jax.experimental.pallas import tpu as pltpu


# ----------------------------------------------------------------------------
# Host-side glue: PIL-style bilinear resize matrices and crop/pad selection
# ----------------------------------------------------------------------------
def _pil_bilinear_matrix(out_size: int, in_size: int) -> np.ndarray:
    """Row-interpolation matrix reproducing PIL Image.BILINEAR resampling
    (triangle filter, antialiased when downscaling)."""
    M = np.zeros((out_size, in_size), dtype=np.float32)
    scale = in_size / out_size
    filterscale = max(scale, 1.0)
    support = 1.0 * filterscale  # bilinear filter support = 1.0
    for i in range(out_size):
        center = (i + 0.5) * scale
        xmin = max(int(center - support + 0.5), 0)
        xmax = min(int(center + support + 0.5), in_size)
        ws = []
        for x in range(xmin, xmax):
            t = (x + 0.5 - center) / filterscale
            ws.append(max(0.0, 1.0 - abs(t)))
        s = sum(ws)
        if s <= 0.0:
            M[i, min(max(int(center), 0), in_size - 1)] = 1.0
            continue
        for k, x in enumerate(range(xmin, xmax)):
            M[i, x] = ws[k] / s
    return M


def _crop_select_matrix(crop_size: int, in_size: int, pad_each_side: int,
                        offset: int) -> np.ndarray:
    """Selection matrix for RandomCrop with pad_if_needed (fill == 0):
    padded axis has length in_size + 2*pad_each_side, take [offset:offset+crop_size].
    Zero rows encode the zero fill."""
    M = np.zeros((crop_size, in_size), dtype=np.float32)
    for r in range(crop_size):
        src = offset + r - pad_each_side
        if 0 <= src < in_size:
            M[r, src] = 1.0
    return M


def _choose_num_planes(nc: int, in_plane_bytes: int, out_plane_bytes: int,
                       budget_bytes: int = 12 << 20) -> int:
    """Planes per grid step.  Budget ~12 MiB of double-buffered block I/O so the
    pipeline stays double-buffered even on v7x (64 MiB physical VMEM, 32 MiB scoped
    default); keep the grid length >= 2 when possible so megacore / dual-TC parts
    can shard the 'parallel' plane axis."""
    per_plane = 2 * (in_plane_bytes + out_plane_bytes)  # x2: double buffering
    k = max(1, budget_bytes // max(per_plane, 1))
    k = int(min(k, nc))
    if k == nc and nc > 1:
        k = max(1, nc // 2)
    while nc % k:  # keep K a divisor of N*C (no remainder handling needed)
        k -= 1
    return k


# ----------------------------------------------------------------------------
# Pallas kernel wrapper
# ----------------------------------------------------------------------------
def random_distortion(x, img_size, fill=0, percentage=0.1, seed=0,
                      compute_dtype=jnp.bfloat16):
    """Pallas implementation of RandomDistortion.forward on an NCHW batch."""
    assert fill == 0, "only fill=0 (the module default) is supported"
    # TODO(synk): nonzero `fill` would need an additive (1 - coverage) * fill term
    # after the crop stage; the module's default fill=0 is implemented exactly.
    N, C, H, W = x.shape
    Hout, Wout = (img_size, img_size) if isinstance(img_size, int) else tuple(img_size)

    rng = np.random.default_rng(seed)
    # TODO(synk): numpy RNG stream != the reference module's np/torch stream, so the
    # sampled new_w/new_h/crop offsets (and outputs) differ bit-for-bit for a seed.
    new_w = max(1, int(W * rng.uniform(1.0 - percentage, 1.0 + percentage)))
    new_h = max(1, int(H * rng.uniform(1.0 - percentage, 1.0 + percentage)))
    S = max(new_w, new_h)

    # stage 1: PIL bilinear resize (H, W) -> (newH, newW)
    r1h = _pil_bilinear_matrix(new_h, H)                # (newH, H)
    r1w = _pil_bilinear_matrix(new_w, W)                # (newW, W)

    # stage 2: RandomCrop(S, pad_if_needed=True, fill=0) semantics (torchvision):
    # pad each side by (S - dim) when dim < S, then uniform random top-left.
    pad_w = S - new_w if new_w < S else 0
    pad_h = S - new_h if new_h < S else 0
    off_i = int(rng.integers(0, new_h + 2 * pad_h - S + 1))
    off_j = int(rng.integers(0, new_w + 2 * pad_w - S + 1))
    ch = _crop_select_matrix(S, new_h, pad_h, off_i)    # (S, newH)
    cw = _crop_select_matrix(S, new_w, pad_w, off_j)    # (S, newW)

    # stage 3: bilinear resize back to img_size
    r2h = _pil_bilinear_matrix(Hout, S)                 # (Hout, S)
    r2w = _pil_bilinear_matrix(Wout, S)                 # (Wout, S)

    # Fold all three stages into two matrices (exact for fill=0):
    #   out_plane = A @ plane @ Bt
    A = (r2h @ ch @ r1h).astype(np.float32)             # (Hout, H)
    Bt = (r1w.T @ cw.T @ r2w.T).astype(np.float32)      # (W, Wout)
    a_dev = jnp.asarray(A, dtype=compute_dtype)
    bt_dev = jnp.asarray(Bt, dtype=compute_dtype)

    NC = N * C
    itemsize = jnp.dtype(x.dtype).itemsize
    K = _choose_num_planes(NC, H * W * itemsize, Hout * Wout * itemsize)
    NB = NC // K

    x_flat = x.reshape(NC, H, W)
    out_dtype = x.dtype

    def kernel(x_ref, a_ref, bt_ref, o_ref):
        # (K, H, W) block of planes; collapse leading dims -> stacked 2D operand.
        xb = x_ref[...].reshape(K * H, W).astype(compute_dtype)
        # Right multiply (width resample + crop) for all K planes in ONE matmul.
        y = jnp.dot(xb, bt_ref[...], preferred_element_type=jnp.float32)   # (K*H, Wout)
        y = y.astype(compute_dtype)
        # Lay the K planes side-by-side along lanes: (H, K*Wout).  (Static row slices +
        # minor-dim concat; keeps everything 2D and the second matmul lane-wide.)
        if K == 1:
            yt = y
        else:
            yt = jnp.concatenate([y[p * H:(p + 1) * H, :] for p in range(K)], axis=1)
        # Left multiply (height resample + crop): lane-dense (Hout, K*Wout) result.
        # NOTE: with this stacked/concat structure the contraction order is fixed
        # (right-then-left); for this module's near-symmetric resize ratios the FLOP
        # difference vs. the other order is negligible.
        z = jnp.dot(a_ref[...], yt, preferred_element_type=jnp.float32)    # (Hout, K*Wout)
        if jnp.issubdtype(out_dtype, jnp.integer):
            info = jnp.iinfo(out_dtype)
            z = jnp.clip(jnp.round(z), info.min, info.max)   # PIL-style round+clip
        o_ref[0] = z.astype(o_ref.dtype)

    out = pl.pallas_call(
        kernel,
        out_shape=jax.ShapeDtypeStruct((NB, Hout, K * Wout), out_dtype),
        grid=(NB,),
        in_specs=[
            pl.BlockSpec((K, H, W), lambda i: (i, 0, 0)),     # K planes per step
            pl.BlockSpec((Hout, H), lambda i: (0, 0)),        # folded A (resident)
            pl.BlockSpec((W, Wout), lambda i: (0, 0)),        # folded Bt (resident)
        ],
        out_specs=pl.BlockSpec((1, Hout, K * Wout), lambda i: (i, 0, 0)),  # lane-dense slab
        compiler_params=pltpu.CompilerParams(
            dimension_semantics=("parallel",),
            # Above the 16/32 MiB default scoped limits, below v7x's 64 MiB physical.
            vmem_limit_bytes=48 << 20,
        ),
    )(x_flat, a_dev, bt_dev)

    # Un-stack the lane-packed planes (wrapper-side layout plumbing).
    out = (out.reshape(NB, Hout, K, Wout)
              .transpose(0, 2, 1, 3)
              .reshape(N, C, Hout, Wout))
    return out


if __name__ == "__main__":
    key = jax.random.PRNGKey(0)
    x = jax.random.uniform(key, (2, 4, 16, 16), dtype=jnp.float32)

    out = random_distortion(x, img_size=(16, 16), fill=0, percentage=0.1, seed=0)
    out = jax.block_until_ready(out)

    assert out.shape == (2, 4, 16, 16)
    assert out.dtype == x.dtype
    assert bool(jnp.all(jnp.isfinite(out)))
    print("KERNEL_OK")
</pallas_src>

<mosaic_0001>
module attributes {stable_mosaic.version = 11 : i64} {
  func.func @kernel(%arg0: i32, %arg1: memref<4x16x16xf32, #tpu.memory_space<vmem>>, %arg2: memref<16x16xbf16, #tpu.memory_space<vmem>>, %arg3: memref<16x16xbf16, #tpu.memory_space<vmem>>, %arg4: memref<1x16x64xf32, #tpu.memory_space<vmem>>) attributes {dimension_semantics = [#tpu.dimension_semantics<parallel>], iteration_bounds = array<i64: 2>, scalar_prefetch = 0 : i64, scratch_operands = 0 : i64, tpu.core_type = #tpu.core_type<tc>, window_params = [{transform_indices = @transform_0, window_bounds = array<i64: 4, 16, 16>}, {pipeline_mode = #tpu.pipeline_mode<synchronous>, transform_indices = @transform_1, window_bounds = array<i64: 16, 16>}, {pipeline_mode = #tpu.pipeline_mode<synchronous>, transform_indices = @transform_2, window_bounds = array<i64: 16, 16>}, {transform_indices = @transform_3, window_bounds = array<i64: 1, 16, 64>}]} {
    %c0 = arith.constant 0 : index
    %c0_0 = arith.constant 0 : index
    %c0_1 = arith.constant 0 : index
    %0 = vector.load %arg1[%c0, %c0_0, %c0_1] : memref<4x16x16xf32, #tpu.memory_space<vmem>>, vector<4x16x16xf32>
    %1 = vector.shape_cast %0 : vector<4x16x16xf32> to vector<64x16xf32>
    %2 = arith.truncf %1 : vector<64x16xf32> to vector<64x16xbf16>
    %c0_2 = arith.constant 0 : index
    %c0_3 = arith.constant 0 : index
    %3 = vector.load %arg3[%c0_2, %c0_3] : memref<16x16xbf16, #tpu.memory_space<vmem>>, vector<16x16xbf16>
    %cst = arith.constant dense<0.000000e+00> : vector<64x16xf32>
    %4 = tpu.matmul %2, %3, %cst {dimension_numbers = #tpu.dot_dimension_numbers<[1], [0], [0], [1], [0, 0, 1, 1], [], []>} : vector<64x16xbf16>, vector<16x16xbf16>, vector<64x16xf32> -> vector<64x16xf32>
    %5 = arith.truncf %4 : vector<64x16xf32> to vector<64x16xbf16>
    %6 = vector.extract_strided_slice %5 {offsets = [0, 0], sizes = [16, 16], strides = [1, 1]} : vector<64x16xbf16> to vector<16x16xbf16>
    %7 = vector.extract_strided_slice %5 {offsets = [16, 0], sizes = [16, 16], strides = [1, 1]} : vector<64x16xbf16> to vector<16x16xbf16>
    %8 = vector.extract_strided_slice %5 {offsets = [32, 0], sizes = [16, 16], strides = [1, 1]} : vector<64x16xbf16> to vector<16x16xbf16>
    %9 = vector.extract_strided_slice %5 {offsets = [48, 0], sizes = [16, 16], strides = [1, 1]} : vector<64x16xbf16> to vector<16x16xbf16>
    %10 = tpu.concatenate %6, %7, %8, %9 in 1 : vector<16x16xbf16>, vector<16x16xbf16>, vector<16x16xbf16>, vector<16x16xbf16> -> vector<16x64xbf16>
    %c0_4 = arith.constant 0 : index
    %c0_5 = arith.constant 0 : index
    %11 = vector.load %arg2[%c0_4, %c0_5] : memref<16x16xbf16, #tpu.memory_space<vmem>>, vector<16x16xbf16>
    %cst_6 = arith.constant dense<0.000000e+00> : vector<16x64xf32>
    %12 = tpu.matmul %11, %10, %cst_6 {dimension_numbers = #tpu.dot_dimension_numbers<[1], [0], [0], [1], [0, 0, 1, 1], [], []>} : vector<16x16xbf16>, vector<16x64xbf16>, vector<16x64xf32> -> vector<16x64xf32>
    %c0_7 = arith.constant 0 : index
    %c0_8 = arith.constant 0 : index
    %c0_9 = arith.constant 0 : index
    %13 = vector.load %arg4[%c0_7, %c0_8, %c0_9] : memref<1x16x64xf32, #tpu.memory_space<vmem>>, vector<1x16x64xf32>
    %14 = vector.shape_cast %13 : vector<1x16x64xf32> to vector<16x64xf32>
    %15 = vector.shape_cast %12 : vector<16x64xf32> to vector<1x16x64xf32>
    tpu.vector_store %arg4[%c0_7, %c0_8, %c0_9], %15 {strides = array<i32>} : memref<1x16x64xf32, #tpu.memory_space<vmem>>, vector<1x16x64xf32>,
    return
  }
  func.func @transform_0(%arg0: i32) -> (i32, i32, i32) {
    %c0_i32 = arith.constant 0 : i32
    %c0_i32_0 = arith.constant 0 : i32
    %c0_i32_1 = arith.constant 0 : i32
    return %arg0, %c0_i32, %c0_i32_0 : i32, i32, i32
  }
  func.func @transform_1(%arg0: i32) -> (i32, i32) {
    %c0_i32 = arith.constant 0 : i32
    %c0_i32_0 = arith.constant 0 : i32
    %c0_i32_1 = arith.constant 0 : i32
    return %c0_i32, %c0_i32_0 : i32, i32
  }
  func.func @transform_2(%arg0: i32) -> (i32, i32) {
    %c0_i32 = arith.constant 0 : i32
    %c0_i32_0 = arith.constant 0 : i32
    %c0_i32_1 = arith.constant 0 : i32
    return %c0_i32, %c0_i32_0 : i32, i32
  }
  func.func @transform_3(%arg0: i32) -> (i32, i32, i32) {
    %c0_i32 = arith.constant 0 : i32
    %c0_i32_0 = arith.constant 0 : i32
    %c0_i32_1 = arith.constant 0 : i32
    return %arg0, %c0_i32, %c0_i32_0 : i32, i32, i32
  }
}

</mosaic_0001>

<bundles_post_ra>
// kernel: tpu_custom_call.1
= control target key start
LH: loop header
LB: loop body
LE: loop exit
PB: predicated region body
PF: predicated region fallthrough
CT: control target
= control target key end

     0   :  { %8 = vsyncpa [#allocation3], 0  ;;  %s1068_s0 = inlined_call_operand.hbm [shape: f32[8,16,16], index: 0, kind: input, shape index: {}]   ;;  %s1069_s1 = inlined_call_operand.hbm [shape: bf16[16,16], index: 1, kind: input, shape index: {}]   ;;  %s1070_s2 = inlined_call_operand.hbm [shape: bf16[16,16], index: 2, kind: input, shape index: {}]   ;;  %s1071_s3 = inlined_call_operand.hbm [shape: f32[2,16,64], index: 3, kind: output, shape index: {}]  }
   0x1   :  { %10 = vsyncpa [#allocation3 + $0x1], 0 }
   0x2   :  { %11 = vsyncpa [#allocation6], 0 }
   0x3   :  { %12 = vsyncpa [#allocation4], 0 }
   0x4   :  { %14 = vsyncpa [#allocation4 + $0x1], 0  ;;  %s827_s12 = smov 0   ;;  %s829_s13 = smov 0  }
   0x5   :  { %s831_s14 = smov 0   ;;  %s833_s15 = smov 0  }
   0x6 LB: > { %s848_s16 = sadd.s32 4294967295, %s790_s15   ;;  %s502_s17 = sadd.s32 4294967294, %s790_s15   ;;  %s790_s15 = sphi %s833_s15, %s1091_s15   ;;  %s786_s14 = sphi %s831_s14, %s1090_s14   ;;  %s782_s13 = sphi %s829_s13, %s1089_s13   ;;  %s778_s12 = sphi %s827_s12, %s1088_s12  }
   0x7   : > { %p40_p0 = scmp.ne.s32.totalorder %s782_s13, %s778_s12  ;;  %p1072_p1 = scmp.eq.s32.totalorder %s848_s16, 0 }
   0x8   : > { %p112_p3 = scmp.eq.s32.totalorder %s502_s17, 1  ;;  %p503_p5 = scmp.ge.s32.totalorder %s790_s15, 1 }
   0x9   : > { %p857_p4 = por %p1072_p1, %p40_p0  ;;  %p119_p7 = scmp.lt.s32.totalorder %s790_s15, 3 }
   0xa   : > { %p862_p6 = por %p112_p3, %p40_p0  ;;  %s792_s21 = smov [#allocation5]  }
   0xb   : > { %s1075_s18 = scalar_select %p857_p4, 1, 0 }
   0xc   : > { %s1076_s19 = scalar_select %p862_p6, 1, 0 }
   0xd   : > { %p867_p8 = pnand %p503_p5, %p119_p7  ;;  %s131_s22 = sshll.u32 %s792_s21, 4  ;;  %s871_s22 = int_to_ptr.vmem [resolvable:$true] %s131_s22 }
   0xe   : > { %s793_s24 = smov [#allocation7]   ;;  %s634_s28 = scalar_lea.hbm %s1069_s1, 128 }
   0xf   : > { %p566_p9 = pneg %p867_p8  ;;  %s144_s25 = sshll.u32 %s793_s24, 4  ;;  %s882_s25 = int_to_ptr.vmem [resolvable:$true] %s144_s25 }
  0x10   : > { %p635_p12 = scmp.ne.s32.totalorder %s1069_s1, %s634_s28  ;;  %p641_p5 = scmp.lt.u32.totalorder %s634_s28, %s1069_s1 }
  0x11   : > { %p878_p11 = pnand %p566_p9, %p1072_p1 }
  0x13   : > { %p636_p13 = pneg %p878_p11 }
  0x15   : > { %p637_p0 = pnand %p636_p13, %p635_p12 }
  0x17   : > { %p638_p3 = pneg %p637_p0 }
  0x19   : > { %p643_p7 = pnand %p641_p5, %p638_p3 }
  0x1b   : > { %646 = shalt.err (!%p643_p7)
}
  0x1c   : > { %s647_s6 = scalar_lea.vmem %s871_s22, 128  ;;  %p655_p2 = scmp.lt.s32.totalorder %s871_s22, %s871_s22 }
  0x1d   : > { %p648_p9 = scmp.ne.s32.totalorder %s871_s22, %s647_s6  ;;  %p656_p12 = scmp.lt.s32.totalorder %s647_s6, %s647_s6 }
  0x1f   : > { %p650_p10 = pnand %p648_p9, %p636_p13  ;;  %p657_p0 = por %p656_p12, %p655_p2 }
  0x21   : > { %p651_p1 = pneg %p650_p10 }
  0x23   : > { %p658_p6 = pnand %p657_p0, %p651_p1 }
  0x25   : > { %661 = shalt.err (!%p658_p6)
}
  0x26   : > { %s794_s7 = smov 64   ;;  %s795_s8 = smov 4  }
  0x27   : > { %569 = dma.hbm_to_vmem [thread:$0]  (!%p878_p11), %s1069_s1, 128, %s871_s22, [#allocation6], %s794_s7, %s794_s7, %s795_s8  }
  0x28   : > { %s662_s21 = scalar_lea.hbm %s1070_s2, 128 }
  0x29   : > { %p663_p2 = scmp.ne.s32.totalorder %s1070_s2, %s662_s21  ;;  %p669_p10 = scmp.lt.u32.totalorder %s662_s21, %s1070_s2 }
  0x2b   : > { %p665_p1 = pnand %p663_p2, %p636_p13 }
  0x2d   : > { %p666_p6 = pneg %p665_p1 }
  0x2f   : > { %p671_p3 = pnand %p669_p10, %p666_p6 }
  0x31   : > { %674 = shalt.err (!%p671_p3)
}
  0x32   : > { %s675_s22 = scalar_lea.vmem %s882_s25, 128  ;;  %p683_p12 = scmp.lt.s32.totalorder %s882_s25, %s882_s25 }
  0x33   : > { %p676_p5 = scmp.ne.s32.totalorder %s882_s25, %s675_s22  ;;  %p684_p0 = scmp.lt.s32.totalorder %s675_s22, %s675_s22 }
  0x35   : > { %p678_p7 = pnand %p676_p5, %p636_p13  ;;  %p685_p2 = por %p684_p0, %p683_p12 }
  0x37   : > { %p679_p9 = pneg %p678_p7 }
  0x39   : > { %p686_p1 = pnand %p685_p2, %p679_p9 }
  0x3b   : > { %689 = shalt.err (!%p686_p1)
}
  0x3c   : > { %572 = dma.hbm_to_vmem [thread:$0]  (!%p878_p11), %s1070_s2, 128, %s882_s25, [#allocation6], %s794_s7, %s794_s7, %s795_s8  }
  0x3d   : > { %s937_s4 = sadd.s32 1, %s790_s15   ;;  %s27_s23 = sadd.s32 1, %s786_s14 }
  0x3e   : > { %s24_s5 = ssub.s32 %s790_s15, %s937_s4  ;;  %p34_p13 = scmp.ne.s32.totalorder %s786_s14, %s782_s13 }
  0x3f   : > { %p25_p6 = scmp.eq.s32.totalorder %s24_s5, 0  ;;  %p35_p10 = scmp.eq.s32.totalorder %s790_s15, 0 }
  0x40   : > { %p1079_p3 = scmp.eq.s32.totalorder %s848_s16, 1  ;;  %p583_p7 = scmp.lt.s32.totalorder %s790_s15, 2 }
  0x41   : > { %s953_s9 = scalar_select %p25_p6, %s786_s14, %s27_s23  }
  0x42   : > { %p947_p5 = por %p1079_p3, %p34_p13  ;;  %p36_p9 = por %p35_p10, %p34_p13 }
  0x43   : > { %s158_s10 = sand.u32 1, %s786_s14   ;;  %s529_s25 = sshll.u32 %s790_s15, 10 }
  0x44   : > { %s1080_s6 = scalar_select %p947_p5, 1, 0 }
  0x45   : > { %s507_s11 = sshll.u32 %s158_s10, 6  ;;  %s960_s17 = scalar_lea.hbm %s1068_s0, %s529_s25 }
  0x46   : > { %s162_s21 = scalar_lea.vmem [#allocation2], %s507_s11  ;;  %p964_p11 = pnand %p583_p7, %p36_p9 }
  0x47   : > { %s170_s24 = sshll.u32 %s162_s21, 4  ;;  %s968_s27 = scalar_lea.sflag [#allocation3], %s158_s10  ;;  %s962_s24 = int_to_ptr.vmem [resolvable:$true] %s170_s24 }
  0x48   : > { %s690_s28 = scalar_lea.hbm %s960_s17, 1024  ;;  %p692_p0 = pneg %p964_p11 }
  0x49   : > { %p691_p12 = scmp.ne.s32.totalorder %s960_s17, %s690_s28  ;;  %s695_s30 = scalar_lea.hbm %s1068_s0, 2048 }
  0x4a   : > { %p696_p13 = scmp.lt.u32.totalorder %s960_s17, %s1068_s0  ;;  %p697_p6 = scmp.lt.u32.totalorder %s695_s30, %s690_s28 }
  0x4b   : > { %p693_p2 = pnand %p692_p0, %p691_p12  ;;  %p699_p3 = scmp.lt.u32.totalorder %s690_s28, %s960_s17 }
  0x4c   : > { %p698_p10 = por %p697_p6, %p696_p13 }
  0x4d   : > { %p694_p1 = pneg %p693_p2 }
  0x4e   : > { %p700_p7 = por %p699_p3, %p698_p10 }
  0x50   : > { %p701_p9 = pnand %p700_p7, %p694_p1 }
  0x52   : > { %704 = shalt.err (!%p701_p9)
}
  0x53   : > { %s705_s10 = scalar_lea.vmem %s962_s24, 1024  ;;  %s796_s11 = smov [#allocation2]  }
  0x54   : > { %p706_p12 = scmp.ne.s32.totalorder %s962_s24, %s705_s10  ;;  %s710_s25 = sshll.u32 %s796_s11, 4  ;;  %s711_s25 = int_to_ptr.vmem [resolvable:$false] %s710_s25 }
  0x55   : > { %s712_s7 = scalar_lea.vmem %s711_s25, 2048  ;;  %p713_p4 = scmp.lt.s32.totalorder %s962_s24, %s711_s25 }
  0x56   : > { %p708_p2 = pnand %p706_p12, %p692_p0  ;;  %p714_p13 = scmp.lt.s32.totalorder %s712_s7, %s705_s10 }
  0x58   : > { %p709_p5 = pneg %p708_p2  ;;  %p715_p6 = por %p714_p13, %p713_p4 }
  0x5a   : > { %p716_p10 = pnand %p715_p6, %p709_p5 }
  0x5c   : > { %719 = shalt.err (!%p716_p10)
}
  0x5d   : > { %s797_s8 = smov 128   ;;  %s798_s21 = smov 8  }
  0x5e   : > { %576 = dma.hbm_to_vmem [thread:$0]  (!%p964_p11), %s960_s17, 1024, %s962_s24, %s968_s27, %s797_s8, %s797_s8, %s798_s21  }
  0x5f   : > { %182 = sbr.rel (%p867_p8) target bundleno = 685 (0x2ad), region = 32  ;;  %s999_s28 = sand.u32 (!%p867_p8), 1, %s782_s13  }
  0x60   : > { %s512_s22 = sshll.u32 (!%p867_p8), %s999_s28, 6  ;;  %s185_s29 = scalar_lea.sflag (!%p867_p8), [#allocation3], %s999_s28 }
  0x61   : > { %s188_s30 = scalar_lea.vmem (!%p867_p8), [#allocation2], %s512_s22  ;;  %p1082_p4 = scmp.ne.s32.totalorder (!%p867_p8), %s1075_s18, 0 }
  0x66   : > { %765 = dma.done.wait (%p1082_p4), %s185_s29, 1024  }
  0x67   : > { %767 = vsyncadd (%p1082_p4), %s185_s29, 4294966272  ;;  %p1083_p5 = scmp.eq.s32.totalorder %s848_s16, 0 }
  0x69   : > { %769 = dma.done.wait (%p1083_p5), [#allocation6], 256   ;;  %p1084_p11 = pmov %p1083_p5 }
  0x6a   : > { %v632_v0 = vld [vmem:[#allocation7] sm:$0xff]   ;;  %v221_v1 = vld [vmem:[%s188_s30] sm:$0xff]  ;;  %vm241_vm0 = vcmask 130048   ;;  %v223_v3 = vld [vmem:[%s188_s30 + $0x10] sm:$0xff]  ;;  %v799_v16 = vmov 0.0   ;;  %vm800_vm1 = vmmov 0  }
  0x6b   : > { %771 = vsyncadd (%p1084_p11), [#allocation6], 4294967040  ;;  %v222_v2 = vld [vmem:[%s188_s30 + $0x8] sm:$0xff]  ;;  %538 = vmatprep.subr.bf16.mxu0 %v632_v0  ;;  %v224_v5 = vld [vmem:[%s188_s30 + $0x18] sm:$0xff]  ;;  %548 = vmatprep.subr.bf16.mxu1 %v799_v16  ;;  %s801_s18 = smov 16   ;;  %s802_s20 = smov 48  }
  0x6c   : > { %v229_v4 = vpack.c.bf16 %v222_v2, %v221_v1  ;;  %v225_v6 = vld [vmem:[%s188_s30 + $0x20] sm:$0xff]  ;;  %v226_v7 = vld [vmem:[%s188_s30 + $0x28] sm:$0xff]  ;;  %539 = vmatpush3.bf16.msra.mxu0 %v632_v0  ;;  %v230_v8 = vpack.c.bf16 %v224_v5, %v223_v3  ;;  %v227_v10 = vld [vmem:[%s188_s30 + $0x30] sm:$0xff]  ;;  %550 = vmatprep.mubr.msk.bf16.mxu1 %vm800_vm1, %v799_v16  ;;  %s803_s17 = smov 32   ;;  %vm335_vm2 = vcmask 261120   ;;  %vm338_vm3 = vcmask 392192  }
  0x6d   : > { %v231_v9 = vpack.c.bf16 %v226_v7, %v225_v6  ;;  %v228_v11 = vld [vmem:[%s188_s30 + $0x38] sm:$0xff]  ;;  %v633_v32 = vld [vmem:[#allocation5] sm:$0xff]   ;;  %s515_s24 = sshll.u32 %s999_s28, 4  ;;  %s530_s23 = sshll.u32 %s848_s16, 8  ;;  %vm393_vm4 = vcmask 523264  }
  0x6e   : > { %540 = vmatprep.mubr.msk.bf16.mxu0 %vm241_vm0, %v229_v4  ;;  %v232_v12 = vpack.c.bf16 %v228_v11, %v227_v10  ;;  %s218_s26 = scalar_lea.vmem [#allocation8], %s515_s24  ;;  %s1024_s11 = scalar_lea.hbm %s1071_s3, %s530_s23 }
  0x6f   : > { %541 = vmatmul.mubr.msk.bf16.vlgmr.msra.gmra.mrb[0].mxu0 %vm241_vm0, %v230_v8  ;;  %s410_s27 = sshll.u32 %s218_s26, 4  ;;  %s397_s25 = scalar_lea.sflag [#allocation4], %s999_s28  ;;  %s1019_s27 = int_to_ptr.vmem [resolvable:$true] %s410_s27 }
  0x70   : > { %544 = vmatprep.mubr.msk.bf16.mxu0 %vm241_vm0, %v231_v9  ;;  %s720_s7 = scalar_lea.vmem %s1019_s27, 256  ;;  %p1085_p0 = scmp.ne.s32.totalorder %s1080_s6, 0 }
  0x71   : > { %p721_p8 = scmp.ne.s32.totalorder %s1019_s27, %s720_s7  ;;  %s804_s16 = smov [#allocation8]  }
  0x72   : > { %s724_s8 = sshll.u32 %s804_s16, 4  ;;  %s725_s8 = int_to_ptr.vmem [resolvable:$false] %s724_s8 }
  0x73   : > { %p722_p1 = pnand %p721_p8, %p1085_p0  ;;  %s726_s21 = scalar_lea.vmem %s725_s8, 512 }
  0x74   : > { %p727_p7 = scmp.lt.s32.totalorder %s1019_s27, %s725_s8  ;;  %p728_p9 = scmp.lt.s32.totalorder %s726_s21, %s720_s7 }
  0x75   : > { %p723_p3 = pneg %p722_p1 }
  0x76   : > { %p729_p12 = por %p728_p9, %p727_p7 }
  0x77   : > { %545 = vmatmul.mubr.msk.bf16.gmra.mrb[4].mxu0 %vm241_vm0, %v232_v12 }
  0x78   : > { %p730_p2 = pnand %p729_p12, %p723_p3 }
 0x142   : > { %v542_v13 = vpop.f32.mrb[0].mxu0 }
 0x143   : > { %v288_v14 = vpop.f32.mrb[1].mxu0 }
 0x144   : > { %v543_v15 = vpop.f32.mrb[2].mxu0 }
 0x145   : > { %v320_v17 = vpack.c.bf16 %v543_v15, %v542_v13  ;;  %v291_v18 = vpop.f32.mrb[3].mxu0 }
 0x146   : > { %v319_v19 = vpack.c.bf16 %v291_v18, %v288_v14 }
 0x147   : > { %324 = vrot.lane.b32.xlu0 %v320_v17, %s801_s18 }
 0x14a   : > { %v546_v20 = vpop.f32.mrb[4].mxu0 }
 0x14b   : > { %v304_v21 = vpop.f32.mrb[5].mxu0 }
 0x14c   : > { %v547_v22 = vpop.f32.mrb[6].mxu0 }
 0x14d   : > { %v322_v23 = vpack.c.bf16 %v547_v22, %v546_v20  ;;  %v307_v24 = vpop.f32.mrb[7].mxu0 }
 0x14e   : > { %v321_v25 = vpack.c.bf16 %v307_v24, %v304_v21 }
 0x14f   : > { %330 = vrot.lane.b32.xlu1 %v322_v23, %s802_s20 }
 0x150   : > { %327 = vrot.lane.b32.xlu0 %v321_v25, %s803_s17 }
 0x1b9   : > { %v325_v26 = vpop.permute.xlu0 %324 }
 0x1ba   : > { %v334_v27 = vsel %vm241_vm0, %v319_v19, %v325_v26 }
 0x1c1   : > { %v331_v29 = vpop.permute.xlu1 %330 }
 0x1c2   : > { %v328_v28 = vpop.permute.xlu0 %327 }
 0x1c3   : > { %v337_v30 = vsel %vm335_vm2, %v334_v27, %v328_v28 }
 0x1c4   : > { %v340_v31 = vsel %vm338_vm3, %v337_v30, %v331_v29 }
 0x1c5   : > { %549 = vmatpush3.bf16.msra.mxu1 %v340_v31 }
 0x1c8   : > { %551 = vmatmul.mubr.msk.bf16.vlgmr.msra.gmra.mrb[0].mxu1 %vm241_vm0, %v633_v32 }
 0x29b   : > { %v386_v33 = vpop.f32.mrb[0].mxu1 }
 0x29c   : > { %394 = vst.msk [vmem:[%s218_s26] sm:$0xff] %vm393_vm4, %v386_v33  ;;  %v552_v34 = vpop.f32.mrb[1].mxu1 }
 0x29d   : > { %v389_v35 = vpop.f32.mrb[2].mxu1 }
 0x29e   : > { %395 = vst.msk [vmem:[%s218_s26 + $0x8] sm:$0xff] %vm393_vm4, %v389_v35  ;;  %v553_v36 = vpop.f32.mrb[3].mxu1 }
 0x29f   : > { %733 = shalt.err (!%p730_p2)
}
 0x2a0   : > { %s734_s22 = scalar_lea.hbm %s1024_s11, 256  ;;  %s738_s18 = scalar_lea.hbm %s1071_s3, 512 }
 0x2a1   : > { %p735_p13 = scmp.ne.s32.totalorder %s1024_s11, %s734_s22  ;;  %p739_p4 = scmp.lt.u32.totalorder %s1024_s11, %s1071_s3 }
 0x2a2   : > { %p740_p5 = scmp.lt.u32.totalorder %s738_s18, %s734_s22  ;;  %p742_p8 = scmp.lt.u32.totalorder %s734_s22, %s1024_s11 }
 0x2a3   : > { %p736_p6 = pnand %p735_p13, %p1085_p0 }
 0x2a4   : > { %p741_p11 = por %p740_p5, %p739_p4 }
 0x2a5   : > { %p737_p10 = pneg %p736_p6 }
 0x2a6   : > { %p743_p1 = por %p742_p8, %p741_p11 }
 0x2a8   : > { %p744_p3 = pnand %p743_p1, %p737_p10 }
 0x2aa   : > { %747 = shalt.err (!%p744_p3)
}
 0x2ab   : > { %s805_s24 = smov 128   ;;  %s806_s26 = smov 8  }
 0x2ac   : > { %564 = dma.vmem_to_hbm [thread:$0]  (%p1085_p0), %s1019_s27, 256, %s1024_s11, %s397_s25, %s805_s24, %s805_s24, %s806_s26  }
 0x2ad PF: > { %s425_s23 = sand.u32 1, %s778_s12   ;;  %p1086_p7 = scmp.ne.s32.totalorder %s1076_s19, 0 }
 0x2ae   : > { %p1087_p9 = scmp.ge.s32.totalorder %s790_s15, 2  ;;  %s426_s5 = scalar_lea.sflag [#allocation4], %s425_s23 }
 0x2b0   : > { %p578_p12 = pnand %p1087_p9, %p1086_p7 }
 0x2b2   : > { %773 = dma.done.wait (!%p578_p12), %s426_s5, 256  }
 0x2b3   : > { %775 = vsyncadd (!%p578_p12), %s426_s5, 4294967040  ;;  %p17_p2 = scmp.ge.s32.totalorder %s937_s4, 4   ;;  %s1088_s12 = smov %s782_s13 }
 0x2b4   : > { %s1089_s13 = smov %s786_s14  ;;  %s1090_s14 = smov %s953_s9 }
 0x2b5   : > { %s1091_s15 = smov %s937_s4  ;;  %19 = sbr.rel (!%p17_p2) target bundleno = 6 (0x6), region = 85 }
 0x2bc   :  { %431 = vsyncpa [#allocation3], 1 }
 0x2bd   :  { %433 = vsyncpa [#allocation3 + $0x1], 1 }
 0x2be   :  { %434 = vsyncpa [#allocation6], 1 }
 0x2bf   :  { %435 = vsyncpa [#allocation4], 1 }
 0x2c0   :  { %437 = vsyncpa [#allocation4 + $0x1], 1 }

</bundles_post_ra>
